<compile_context>
chip_gen: v7x
topology: tpu7x:2x2x1
jax: 0.10.0
libtpu: 0.0.40
codegen_flags: <defaults>
</compile_context>

<pallas_src>
import functools
import math

import jax
import jax.numpy as jnp
from jax.experimental import pallas as pl
from jax.experimental.pallas import tpu as pltpu

NUM_CLASSES = 10  # stand-in for len(AV2_CLASS_NAMES)
NUM_LAYERS = 2


def lstm_model_kernel(x_ref, cemb_ref, w_ref, out_ref, x_scr,
                      *, n_time, n_batch, e_dim, d_pad, num_layers):
    E = e_dim
    bias_base = d_pad + (2 * num_layers + 1) * E

    # ---- input projection (input_proj bias folded into cemb on host) + ReLU --
    wp = w_ref[0:d_pad, 0:E]                                      # (d_pad, E)
    emb = jnp.dot(x_ref[...], wp, preferred_element_type=jnp.float32)
    x_scr[...] = jnp.maximum(emb + cemb_ref[...], 0.0)            # (B*L, E)

    # ---- residual LSTM layers; gate columns host-reordered to [i | f | o | 2g]
    for layer in range(num_layers):
        off = d_pad + 2 * layer * E
        wx = w_ref[off:off + E, :]                                # (E, W)
        wh = w_ref[off + E:off + 2 * E, :]                        # (E, W)
        b = w_ref[bias_base + 8 * layer:bias_base + 8 * layer + 1, :]

        # input contribution for all timesteps at once: (B*L, W)
        gates_x = jnp.dot(x_scr[...], wx,
                          preferred_element_type=jnp.float32) + b

        h = jnp.zeros((n_batch, E), jnp.float32)
        c = jnp.zeros((n_batch, E), jnp.float32)
        # n_time (= B, batch_first=False quirk) is tiny → static unroll.
        for t in range(n_time):
            r0 = t * n_batch                                      # 8-aligned
            g = gates_x[r0:r0 + n_batch, :] + jnp.dot(
                h, wh, preferred_element_type=jnp.float32)
            sig = jax.nn.sigmoid(g)                 # ONE full-width EUP pass
            i_g = sig[:, 0:E]
            f_g = sig[:, E:2 * E]
            o_g = sig[:, 2 * E:3 * E]
            g_g = 2.0 * sig[:, 3 * E:4 * E] - 1.0   # tanh(x) = 2*sigmoid(2x)-1
            c = f_g * c + i_g * g_g
            h = o_g * jnp.tanh(c)
            # residual add fused into a contiguous row-block store
            x_scr[r0:r0 + n_batch, :] = x_scr[r0:r0 + n_batch, :] + h
        # TODO(synk): nn.Dropout modeled as identity (eval mode); no stochastic mask.

    # ---- fused reg+cls heads: one matmul, one lane-dense (B*L, 128·n) store --
    w_head = w_ref[d_pad + 2 * num_layers * E:d_pad + (2 * num_layers + 1) * E, :]
    b_head = w_ref[bias_base + 8 * num_layers:bias_base + 8 * num_layers + 1, :]
    out_ref[...] = jnp.dot(x_scr[...], w_head,
                           preferred_element_type=jnp.float32) + b_head


def _build_slab(params, *, D, E, num_layers, d_pad, W):
    """Pack all weights and biases into one (rows, W) f32 slab."""
    def pad_lanes(a):
        return jnp.pad(a, ((0, 0), (0, W - a.shape[1])))

    def reorder_scale(a):
        # PyTorch LSTM row blocks [i, f, g, o] -> [i, f, o, 2*g]
        return jnp.concatenate(
            [a[0:E], a[E:2 * E], a[3 * E:4 * E], 2.0 * a[2 * E:3 * E]], axis=0)

    rows = [pad_lanes(jnp.pad(params["input_proj_w"].T,
                              ((0, d_pad - D), (0, 0))))]         # (d_pad, W)
    biases = []
    for li in range(num_layers):
        rows.append(pad_lanes(reorder_scale(params[f"lstm{li}_wih"]).T))  # (E, W)
        rows.append(pad_lanes(reorder_scale(params[f"lstm{li}_whh"]).T))  # (E, W)
        b = reorder_scale(
            (params[f"lstm{li}_bih"] + params[f"lstm{li}_bhh"])[:, None])
        biases.append(b.reshape(1, 4 * E))
    rows.append(pad_lanes(
        jnp.concatenate([params["reg_w"], params["cls_w"]], axis=0).T))   # (E, W)
    biases.append(jnp.concatenate([params["reg_b"], params["cls_b"]])[None, :])
    for b in biases:  # each bias gets its own 8-row (sublane-aligned) block
        rows.append(jnp.pad(pad_lanes(b), ((0, 7), (0, 0))))
    return jnp.concatenate(rows, axis=0).astype(jnp.float32)


def lstm_model_forward(x, class_cond, params, *, k, prediction_len):
    B, L, D = x.shape
    E = params["input_proj_w"].shape[0]
    out_reg_dim = 2 * prediction_len * k
    out_total = out_reg_dim + k
    W = max(4 * E, ((out_total + 127) // 128) * 128)  # lane-dense slab/out width
    d_pad = ((D + 7) // 8) * 8                        # sublane-aligned contraction

    # ---- host-side prep (cheap glue; fused by XLA around the pallas_call) ----
    x2d = jnp.pad(x.reshape(B * L, D), ((0, 0), (0, d_pad - D)))  # (B*L, d_pad)
    # Embedding gather (glue) + input_proj bias, pre-broadcast to (B*L, E).
    cemb = params["emb_table"][class_cond][:, None, :] + params["input_proj_b"]
    cemb = jnp.broadcast_to(cemb, (B, L, E)).reshape(B * L, E)
    w_slab = _build_slab(params, D=D, E=E, num_layers=NUM_LAYERS,
                         d_pad=d_pad, W=W)

    kernel = functools.partial(lstm_model_kernel, n_time=B, n_batch=L,
                               e_dim=E, d_pad=d_pad, num_layers=NUM_LAYERS)
    vmem = pl.BlockSpec(memory_space=pltpu.MemorySpace.VMEM)

    out = pl.pallas_call(
        kernel,
        out_shape=jax.ShapeDtypeStruct((B * L, W), jnp.float32),
        in_specs=[vmem, vmem, vmem],
        out_specs=vmem,
        scratch_shapes=[pltpu.VMEM((B * L, E), jnp.float32)],
    )(x2d, cemb, w_slab)

    out = out.reshape(B, L, W)
    reg = out[:, :, :out_reg_dim].reshape(B, L, k, prediction_len, 2)
    cls = out[:, :, out_reg_dim:out_total]
    return reg, cls


def lstm_model_reference(x, class_cond, params, *, k, prediction_len):
    """Pure-JAX f32 reference mirroring the PyTorch module (eval mode)."""
    B, L, D = x.shape
    E = params["input_proj_w"].shape[0]
    hp = jax.lax.Precision.HIGHEST
    emb = (jnp.dot(x.reshape(B * L, D), params["input_proj_w"].T, precision=hp)
           + params["input_proj_b"]).reshape(B, L, E)
    emb = emb + params["emb_table"][class_cond][:, None, :]
    xx = jax.nn.relu(emb)
    for li in range(NUM_LAYERS):
        wih, whh = params[f"lstm{li}_wih"], params[f"lstm{li}_whh"]
        b = params[f"lstm{li}_bih"] + params[f"lstm{li}_bhh"]
        h = jnp.zeros((L, E), jnp.float32)
        c = jnp.zeros((L, E), jnp.float32)
        outs = []
        for t in range(B):  # time axis = B (batch_first=False)
            g = (jnp.dot(xx[t], wih.T, precision=hp)
                 + jnp.dot(h, whh.T, precision=hp) + b)
            i_g = jax.nn.sigmoid(g[:, 0:E])
            f_g = jax.nn.sigmoid(g[:, E:2 * E])
            g_g = jnp.tanh(g[:, 2 * E:3 * E])
            o_g = jax.nn.sigmoid(g[:, 3 * E:4 * E])
            c = f_g * c + i_g * g_g
            h = o_g * jnp.tanh(c)
            outs.append(h)
        xx = xx + jnp.stack(outs, axis=0)
    feat = xx.reshape(B * L, E)
    reg = (jnp.dot(feat, params["reg_w"].T, precision=hp)
           + params["reg_b"]).reshape(B, L, k, prediction_len, 2)
    cls = (jnp.dot(feat, params["cls_w"].T, precision=hp)
           + params["cls_b"]).reshape(B, L, k)
    return reg, cls


def init_params(key, input_dim, embedding_dim, k, prediction_len):
    E = embedding_dim
    keys = jax.random.split(key, 16)

    def uni(kk, shape, bound):
        return jax.random.uniform(kk, shape, jnp.float32, -bound, bound)

    kaiming_bound = math.sqrt(6.0 / input_dim)  # kaiming_uniform_ on input_proj.weight
    lstm_bound = 1.0 / math.sqrt(E)
    return {
        "emb_table": jax.random.normal(keys[0], (NUM_CLASSES, E), jnp.float32),
        "input_proj_w": uni(keys[1], (E, input_dim), kaiming_bound),
        "input_proj_b": uni(keys[2], (E,), 1.0 / math.sqrt(input_dim)),
        "lstm0_wih": uni(keys[3], (4 * E, E), lstm_bound),
        "lstm0_whh": uni(keys[4], (4 * E, E), lstm_bound),
        "lstm0_bih": uni(keys[5], (4 * E,), lstm_bound),
        "lstm0_bhh": uni(keys[6], (4 * E,), lstm_bound),
        "lstm1_wih": uni(keys[7], (4 * E, E), lstm_bound),
        "lstm1_whh": uni(keys[8], (4 * E, E), lstm_bound),
        "lstm1_bih": uni(keys[9], (4 * E,), lstm_bound),
        "lstm1_bhh": uni(keys[10], (4 * E,), lstm_bound),
        "reg_w": uni(keys[11], (2 * prediction_len * k, E), lstm_bound),
        "reg_b": uni(keys[12], (2 * prediction_len * k,), lstm_bound),
        "cls_w": uni(keys[13], (k, E), lstm_bound),
        "cls_b": uni(keys[14], (k,), lstm_bound),
    }


if __name__ == "__main__":
    key = jax.random.PRNGKey(0)
    k_param, k_x, k_cls = jax.random.split(key, 3)

    B, L, D = 2, 8, 5          # batch, sequence length, input_dim
    E = 32                     # embedding_dim
    k_modes = 3                # k best modes
    pred_len = 6               # prediction_len

    params = init_params(k_param, D, E, k_modes, pred_len)
    x = jax.random.normal(k_x, (B, L, D), jnp.float32)
    class_cond = jax.random.randint(k_cls, (B,), 0, NUM_CLASSES)

    fwd = jax.jit(functools.partial(lstm_model_forward, k=k_modes,
                                    prediction_len=pred_len))
    reg, cls = fwd(x, class_cond, params)
    jax.block_until_ready((reg, cls))

    assert reg.shape == (B, L, k_modes, pred_len, 2), reg.shape
    assert cls.shape == (B, L, k_modes), cls.shape
    assert bool(jnp.all(jnp.isfinite(reg))) and bool(jnp.all(jnp.isfinite(cls)))

    reg_ref, cls_ref = lstm_model_reference(x, class_cond, params,
                                            k=k_modes, prediction_len=pred_len)
    assert bool(jnp.allclose(reg, reg_ref, rtol=5e-2, atol=5e-2)), \
        float(jnp.max(jnp.abs(reg - reg_ref)))
    assert bool(jnp.allclose(cls, cls_ref, rtol=5e-2, atol=5e-2)), \
        float(jnp.max(jnp.abs(cls - cls_ref)))

    print("KERNEL_OK")
</pallas_src>

<mosaic_0001>
module attributes {stable_mosaic.version = 11 : i64} {
  func.func @lstm_model_kernel(%arg0: memref<16x8xf32, #tpu.memory_space<vmem>>, %arg1: memref<16x32xf32, #tpu.memory_space<vmem>>, %arg2: memref<192x128xf32, #tpu.memory_space<vmem>>, %arg3: memref<16x128xf32, #tpu.memory_space<vmem>>, %arg4: memref<16x32xf32, #tpu.memory_space<vmem>>) attributes {dimension_semantics = [], scalar_prefetch = 0 : i64, scratch_operands = 1 : i64, tpu.core_type = #tpu.core_type<tc>} {
    %c0 = arith.constant 0 : index
    %c0_0 = arith.constant 0 : index
    %0 = vector.load %arg2[%c0, %c0_0] : memref<192x128xf32, #tpu.memory_space<vmem>>, vector<8x32xf32>
    %c0_1 = arith.constant 0 : index
    %c0_2 = arith.constant 0 : index
    %1 = vector.load %arg0[%c0_1, %c0_2] : memref<16x8xf32, #tpu.memory_space<vmem>>, vector<16x8xf32>
    %cst = arith.constant dense<0.000000e+00> : vector<16x32xf32>
    %2 = tpu.matmul %1, %0, %cst {dimension_numbers = #tpu.dot_dimension_numbers<[1], [0], [0], [1], [0, 0, 1, 1], [], []>} : vector<16x8xf32>, vector<8x32xf32>, vector<16x32xf32> -> vector<16x32xf32>
    %c0_3 = arith.constant 0 : index
    %c0_4 = arith.constant 0 : index
    %3 = vector.load %arg1[%c0_3, %c0_4] : memref<16x32xf32, #tpu.memory_space<vmem>>, vector<16x32xf32>
    %4 = arith.addf %2, %3 : vector<16x32xf32>
    %cst_5 = arith.constant 0.000000e+00 : f32
    %5 = vector.broadcast %cst_5 : f32 to vector<16x32xf32>
    %6 = arith.maximumf %4, %5 : vector<16x32xf32>
    %c0_6 = arith.constant 0 : index
    %c0_7 = arith.constant 0 : index
    %7 = vector.load %arg4[%c0_6, %c0_7] : memref<16x32xf32, #tpu.memory_space<vmem>>, vector<16x32xf32>
    tpu.vector_store %arg4[%c0_6, %c0_7], %6 {strides = array<i32>} : memref<16x32xf32, #tpu.memory_space<vmem>>, vector<16x32xf32>,
    %c8 = arith.constant 8 : index
    %c0_8 = arith.constant 0 : index
    %8 = vector.load %arg2[%c8, %c0_8] : memref<192x128xf32, #tpu.memory_space<vmem>>, vector<32x128xf32>
    %c40 = arith.constant 40 : index
    %c0_9 = arith.constant 0 : index
    %9 = vector.load %arg2[%c40, %c0_9] : memref<192x128xf32, #tpu.memory_space<vmem>>, vector<32x128xf32>
    %c168 = arith.constant 168 : index
    %c0_10 = arith.constant 0 : index
    %10 = vector.load %arg2[%c168, %c0_10] : memref<192x128xf32, #tpu.memory_space<vmem>>, vector<1x128xf32>
    %c0_11 = arith.constant 0 : index
    %c0_12 = arith.constant 0 : index
    %11 = vector.load %arg4[%c0_11, %c0_12] : memref<16x32xf32, #tpu.memory_space<vmem>>, vector<16x32xf32>
    %cst_13 = arith.constant dense<0.000000e+00> : vector<16x128xf32>
    %12 = tpu.matmul %11, %8, %cst_13 {dimension_numbers = #tpu.dot_dimension_numbers<[1], [0], [0], [1], [0, 0, 1, 1], [], []>} : vector<16x32xf32>, vector<32x128xf32>, vector<16x128xf32> -> vector<16x128xf32>
    %13 = vector.broadcast %10 : vector<1x128xf32> to vector<16x128xf32>
    %14 = arith.addf %12, %13 : vector<16x128xf32>
    %cst_14 = arith.constant 0.000000e+00 : f32
    %15 = vector.broadcast %cst_14 : f32 to vector<8x32xf32>
    %cst_15 = arith.constant 0.000000e+00 : f32
    %16 = vector.broadcast %cst_15 : f32 to vector<8x32xf32>
    %17 = vector.extract_strided_slice %14 {offsets = [0, 0], sizes = [8, 128], strides = [1, 1]} : vector<16x128xf32> to vector<8x128xf32>
    %cst_16 = arith.constant dense<0.000000e+00> : vector<8x128xf32>
    %18 = tpu.matmul %15, %9, %cst_16 {dimension_numbers = #tpu.dot_dimension_numbers<[1], [0], [0], [1], [0, 0, 1, 1], [], []>} : vector<8x32xf32>, vector<32x128xf32>, vector<8x128xf32> -> vector<8x128xf32>
    %19 = arith.addf %17, %18 : vector<8x128xf32>
    %20 = arith.negf %19 : vector<8x128xf32>
    %21 = math.exp %20 : vector<8x128xf32>
    %cst_17 = arith.constant 1.000000e+00 : f32
    %22 = vector.broadcast %cst_17 : f32 to vector<8x128xf32>
    %23 = arith.addf %22, %21 : vector<8x128xf32>
    %24 = arith.divf %22, %23 : vector<8x128xf32>
    %25 = vector.extract_strided_slice %24 {offsets = [0, 0], sizes = [8, 32], strides = [1, 1]} : vector<8x128xf32> to vector<8x32xf32>
    %26 = vector.extract_strided_slice %24 {offsets = [0, 32], sizes = [8, 32], strides = [1, 1]} : vector<8x128xf32> to vector<8x32xf32>
    %27 = vector.extract_strided_slice %24 {offsets = [0, 64], sizes = [8, 32], strides = [1, 1]} : vector<8x128xf32> to vector<8x32xf32>
    %28 = vector.extract_strided_slice %24 {offsets = [0, 96], sizes = [8, 32], strides = [1, 1]} : vector<8x128xf32> to vector<8x32xf32>
    %cst_18 = arith.constant 2.000000e+00 : f32
    %29 = vector.broadcast %cst_18 : f32 to vector<8x32xf32>
    %30 = arith.mulf %29, %28 : vector<8x32xf32>
    %cst_19 = arith.constant 1.000000e+00 : f32
    %31 = vector.broadcast %cst_19 : f32 to vector<8x32xf32>
    %32 = arith.subf %30, %31 : vector<8x32xf32>
    %33 = arith.mulf %26, %16 : vector<8x32xf32>
    %34 = arith.mulf %25, %32 : vector<8x32xf32>
    %35 = arith.addf %33, %34 : vector<8x32xf32>
    %36 = math.tanh %35 : vector<8x32xf32>
    %37 = arith.mulf %27, %36 : vector<8x32xf32>
    %c0_20 = arith.constant 0 : index
    %c0_21 = arith.constant 0 : index
    %38 = vector.load %arg4[%c0_20, %c0_21] : memref<16x32xf32, #tpu.memory_space<vmem>>, vector<8x32xf32>
    %39 = arith.addf %38, %37 : vector<8x32xf32>
    %c0_22 = arith.constant 0 : index
    %c0_23 = arith.constant 0 : index
    %40 = vector.load %arg4[%c0_22, %c0_23] : memref<16x32xf32, #tpu.memory_space<vmem>>, vector<8x32xf32>
    tpu.vector_store %arg4[%c0_22, %c0_23], %39 {strides = array<i32>} : memref<16x32xf32, #tpu.memory_space<vmem>>, vector<8x32xf32>,
    %41 = vector.extract_strided_slice %14 {offsets = [8, 0], sizes = [8, 128], strides = [1, 1]} : vector<16x128xf32> to vector<8x128xf32>
    %cst_24 = arith.constant dense<0.000000e+00> : vector<8x128xf32>
    %42 = tpu.matmul %37, %9, %cst_24 {dimension_numbers = #tpu.dot_dimension_numbers<[1], [0], [0], [1], [0, 0, 1, 1], [], []>} : vector<8x32xf32>, vector<32x128xf32>, vector<8x128xf32> -> vector<8x128xf32>
    %43 = arith.addf %41, %42 : vector<8x128xf32>
    %44 = arith.negf %43 : vector<8x128xf32>
    %45 = math.exp %44 : vector<8x128xf32>
    %cst_25 = arith.constant 1.000000e+00 : f32
    %46 = vector.broadcast %cst_25 : f32 to vector<8x128xf32>
    %47 = arith.addf %46, %45 : vector<8x128xf32>
    %48 = arith.divf %46, %47 : vector<8x128xf32>
    %49 = vector.extract_strided_slice %48 {offsets = [0, 0], sizes = [8, 32], strides = [1, 1]} : vector<8x128xf32> to vector<8x32xf32>
    %50 = vector.extract_strided_slice %48 {offsets = [0, 32], sizes = [8, 32], strides = [1, 1]} : vector<8x128xf32> to vector<8x32xf32>
    %51 = vector.extract_strided_slice %48 {offsets = [0, 64], sizes = [8, 32], strides = [1, 1]} : vector<8x128xf32> to vector<8x32xf32>
    %52 = vector.extract_strided_slice %48 {offsets = [0, 96], sizes = [8, 32], strides = [1, 1]} : vector<8x128xf32> to vector<8x32xf32>
    %cst_26 = arith.constant 2.000000e+00 : f32
    %53 = vector.broadcast %cst_26 : f32 to vector<8x32xf32>
    %54 = arith.mulf %53, %52 : vector<8x32xf32>
    %cst_27 = arith.constant 1.000000e+00 : f32
    %55 = vector.broadcast %cst_27 : f32 to vector<8x32xf32>
    %56 = arith.subf %54, %55 : vector<8x32xf32>
    %57 = arith.mulf %50, %35 : vector<8x32xf32>
    %58 = arith.mulf %49, %56 : vector<8x32xf32>
    %59 = arith.addf %57, %58 : vector<8x32xf32>
    %60 = math.tanh %59 : vector<8x32xf32>
    %61 = arith.mulf %51, %60 : vector<8x32xf32>
    %c8_28 = arith.constant 8 : index
    %c0_29 = arith.constant 0 : index
    %62 = vector.load %arg4[%c8_28, %c0_29] : memref<16x32xf32, #tpu.memory_space<vmem>>, vector<8x32xf32>
    %63 = arith.addf %62, %61 : vector<8x32xf32>
    %c8_30 = arith.constant 8 : index
    %c0_31 = arith.constant 0 : index
    %64 = vector.load %arg4[%c8_30, %c0_31] : memref<16x32xf32, #tpu.memory_space<vmem>>, vector<8x32xf32>
    tpu.vector_store %arg4[%c8_30, %c0_31], %63 {strides = array<i32>} : memref<16x32xf32, #tpu.memory_space<vmem>>, vector<8x32xf32>,
    %c72 = arith.constant 72 : index
    %c0_32 = arith.constant 0 : index
    %65 = vector.load %arg2[%c72, %c0_32] : memref<192x128xf32, #tpu.memory_space<vmem>>, vector<32x128xf32>
    %c104 = arith.constant 104 : index
    %c0_33 = arith.constant 0 : index
    %66 = vector.load %arg2[%c104, %c0_33] : memref<192x128xf32, #tpu.memory_space<vmem>>, vector<32x128xf32>
    %c176 = arith.constant 176 : index
    %c0_34 = arith.constant 0 : index
    %67 = vector.load %arg2[%c176, %c0_34] : memref<192x128xf32, #tpu.memory_space<vmem>>, vector<1x128xf32>
    %c0_35 = arith.constant 0 : index
    %c0_36 = arith.constant 0 : index
    %68 = vector.load %arg4[%c0_35, %c0_36] : memref<16x32xf32, #tpu.memory_space<vmem>>, vector<16x32xf32>
    %cst_37 = arith.constant dense<0.000000e+00> : vector<16x128xf32>
    %69 = tpu.matmul %68, %65, %cst_37 {dimension_numbers = #tpu.dot_dimension_numbers<[1], [0], [0], [1], [0, 0, 1, 1], [], []>} : vector<16x32xf32>, vector<32x128xf32>, vector<16x128xf32> -> vector<16x128xf32>
    %70 = vector.broadcast %67 : vector<1x128xf32> to vector<16x128xf32>
    %71 = arith.addf %69, %70 : vector<16x128xf32>
    %cst_38 = arith.constant 0.000000e+00 : f32
    %72 = vector.broadcast %cst_38 : f32 to vector<8x32xf32>
    %cst_39 = arith.constant 0.000000e+00 : f32
    %73 = vector.broadcast %cst_39 : f32 to vector<8x32xf32>
    %74 = vector.extract_strided_slice %71 {offsets = [0, 0], sizes = [8, 128], strides = [1, 1]} : vector<16x128xf32> to vector<8x128xf32>
    %cst_40 = arith.constant dense<0.000000e+00> : vector<8x128xf32>
    %75 = tpu.matmul %72, %66, %cst_40 {dimension_numbers = #tpu.dot_dimension_numbers<[1], [0], [0], [1], [0, 0, 1, 1], [], []>} : vector<8x32xf32>, vector<32x128xf32>, vector<8x128xf32> -> vector<8x128xf32>
    %76 = arith.addf %74, %75 : vector<8x128xf32>
    %77 = arith.negf %76 : vector<8x128xf32>
    %78 = math.exp %77 : vector<8x128xf32>
    %cst_41 = arith.constant 1.000000e+00 : f32
    %79 = vector.broadcast %cst_41 : f32 to vector<8x128xf32>
    %80 = arith.addf %79, %78 : vector<8x128xf32>
    %81 = arith.divf %79, %80 : vector<8x128xf32>
    %82 = vector.extract_strided_slice %81 {offsets = [0, 0], sizes = [8, 32], strides = [1, 1]} : vector<8x128xf32> to vector<8x32xf32>
    %83 = vector.extract_strided_slice %81 {offsets = [0, 32], sizes = [8, 32], strides = [1, 1]} : vector<8x128xf32> to vector<8x32xf32>
    %84 = vector.extract_strided_slice %81 {offsets = [0, 64], sizes = [8, 32], strides = [1, 1]} : vector<8x128xf32> to vector<8x32xf32>
    %85 = vector.extract_strided_slice %81 {offsets = [0, 96], sizes = [8, 32], strides = [1, 1]} : vector<8x128xf32> to vector<8x32xf32>
    %cst_42 = arith.constant 2.000000e+00 : f32
    %86 = vector.broadcast %cst_42 : f32 to vector<8x32xf32>
    %87 = arith.mulf %86, %85 : vector<8x32xf32>
    %cst_43 = arith.constant 1.000000e+00 : f32
    %88 = vector.broadcast %cst_43 : f32 to vector<8x32xf32>
    %89 = arith.subf %87, %88 : vector<8x32xf32>
    %90 = arith.mulf %83, %73 : vector<8x32xf32>
    %91 = arith.mulf %82, %89 : vector<8x32xf32>
    %92 = arith.addf %90, %91 : vector<8x32xf32>
    %93 = math.tanh %92 : vector<8x32xf32>
    %94 = arith.mulf %84, %93 : vector<8x32xf32>
    %c0_44 = arith.constant 0 : index
    %c0_45 = arith.constant 0 : index
    %95 = vector.load %arg4[%c0_44, %c0_45] : memref<16x32xf32, #tpu.memory_space<vmem>>, vector<8x32xf32>
    %96 = arith.addf %95, %94 : vector<8x32xf32>
    %c0_46 = arith.constant 0 : index
    %c0_47 = arith.constant 0 : index
    %97 = vector.load %arg4[%c0_46, %c0_47] : memref<16x32xf32, #tpu.memory_space<vmem>>, vector<8x32xf32>
    tpu.vector_store %arg4[%c0_46, %c0_47], %96 {strides = array<i32>} : memref<16x32xf32, #tpu.memory_space<vmem>>, vector<8x32xf32>,
    %98 = vector.extract_strided_slice %71 {offsets = [8, 0], sizes = [8, 128], strides = [1, 1]} : vector<16x128xf32> to vector<8x128xf32>
    %cst_48 = arith.constant dense<0.000000e+00> : vector<8x128xf32>
    %99 = tpu.matmul %94, %66, %cst_48 {dimension_numbers = #tpu.dot_dimension_numbers<[1], [0], [0], [1], [0, 0, 1, 1], [], []>} : vector<8x32xf32>, vector<32x128xf32>, vector<8x128xf32> -> vector<8x128xf32>
    %100 = arith.addf %98, %99 : vector<8x128xf32>
    %101 = arith.negf %100 : vector<8x128xf32>
    %102 = math.exp %101 : vector<8x128xf32>
    %cst_49 = arith.constant 1.000000e+00 : f32
    %103 = vector.broadcast %cst_49 : f32 to vector<8x128xf32>
    %104 = arith.addf %103, %102 : vector<8x128xf32>
    %105 = arith.divf %103, %104 : vector<8x128xf32>
    %106 = vector.extract_strided_slice %105 {offsets = [0, 0], sizes = [8, 32], strides = [1, 1]} : vector<8x128xf32> to vector<8x32xf32>
    %107 = vector.extract_strided_slice %105 {offsets = [0, 32], sizes = [8, 32], strides = [1, 1]} : vector<8x128xf32> to vector<8x32xf32>
    %108 = vector.extract_strided_slice %105 {offsets = [0, 64], sizes = [8, 32], strides = [1, 1]} : vector<8x128xf32> to vector<8x32xf32>
    %109 = vector.extract_strided_slice %105 {offsets = [0, 96], sizes = [8, 32], strides = [1, 1]} : vector<8x128xf32> to vector<8x32xf32>
    %cst_50 = arith.constant 2.000000e+00 : f32
    %110 = vector.broadcast %cst_50 : f32 to vector<8x32xf32>
    %111 = arith.mulf %110, %109 : vector<8x32xf32>
    %cst_51 = arith.constant 1.000000e+00 : f32
    %112 = vector.broadcast %cst_51 : f32 to vector<8x32xf32>
    %113 = arith.subf %111, %112 : vector<8x32xf32>
    %114 = arith.mulf %107, %92 : vector<8x32xf32>
    %115 = arith.mulf %106, %113 : vector<8x32xf32>
    %116 = arith.addf %114, %115 : vector<8x32xf32>
    %117 = math.tanh %116 : vector<8x32xf32>
    %118 = arith.mulf %108, %117 : vector<8x32xf32>
    %c8_52 = arith.constant 8 : index
    %c0_53 = arith.constant 0 : index
    %119 = vector.load %arg4[%c8_52, %c0_53] : memref<16x32xf32, #tpu.memory_space<vmem>>, vector<8x32xf32>
    %120 = arith.addf %119, %118 : vector<8x32xf32>
    %c8_54 = arith.constant 8 : index
    %c0_55 = arith.constant 0 : index
    %121 = vector.load %arg4[%c8_54, %c0_55] : memref<16x32xf32, #tpu.memory_space<vmem>>, vector<8x32xf32>
    tpu.vector_store %arg4[%c8_54, %c0_55], %120 {strides = array<i32>} : memref<16x32xf32, #tpu.memory_space<vmem>>, vector<8x32xf32>,
    %c136 = arith.constant 136 : index
    %c0_56 = arith.constant 0 : index
    %122 = vector.load %arg2[%c136, %c0_56] : memref<192x128xf32, #tpu.memory_space<vmem>>, vector<32x128xf32>
    %c184 = arith.constant 184 : index
    %c0_57 = arith.constant 0 : index
    %123 = vector.load %arg2[%c184, %c0_57] : memref<192x128xf32, #tpu.memory_space<vmem>>, vector<1x128xf32>
    %c0_58 = arith.constant 0 : index
    %c0_59 = arith.constant 0 : index
    %124 = vector.load %arg4[%c0_58, %c0_59] : memref<16x32xf32, #tpu.memory_space<vmem>>, vector<16x32xf32>
    %cst_60 = arith.constant dense<0.000000e+00> : vector<16x128xf32>
    %125 = tpu.matmul %124, %122, %cst_60 {dimension_numbers = #tpu.dot_dimension_numbers<[1], [0], [0], [1], [0, 0, 1, 1], [], []>} : vector<16x32xf32>, vector<32x128xf32>, vector<16x128xf32> -> vector<16x128xf32>
    %126 = vector.broadcast %123 : vector<1x128xf32> to vector<16x128xf32>
    %127 = arith.addf %125, %126 : vector<16x128xf32>
    %c0_61 = arith.constant 0 : index
    %c0_62 = arith.constant 0 : index
    %128 = vector.load %arg3[%c0_61, %c0_62] : memref<16x128xf32, #tpu.memory_space<vmem>>, vector<16x128xf32>
    tpu.vector_store %arg3[%c0_61, %c0_62], %127 {strides = array<i32>} : memref<16x128xf32, #tpu.memory_space<vmem>>, vector<16x128xf32>,
    return
  }
}

</mosaic_0001>

<bundles_post_ra>
// kernel: lstm_model_forward.1
= control target key start
LH: loop header
LB: loop body
LE: loop exit
PB: predicated region body
PF: predicated region fallthrough
CT: control target
= control target key end

     0   :  { %vm19_vm0 = vcmask 64512   ;;  %v1036_v9 = vmov 0.0|0.0   ;;  %vm1037_vm1 = vmmov 0   ;;  %v1038_v16 = vmov 0.0   ;;  %s1039_s11 = smov 32   ;;  %s1040_s12 = smov 64   ;;  %s1211_s2 = inlined_call_operand.vmem [shape: f32[192,128], index: 2, kind: input, shape index: {}]   ;;  %s1212_s0 = inlined_call_operand.vmem [shape: f32[16,8], index: 0, kind: input, shape index: {}]   ;;  %s1213_s1 = inlined_call_operand.vmem [shape: f32[16,32], index: 1, kind: input, shape index: {}]   ;;  %s1214_s3 = inlined_call_operand.vmem [shape: f32[16,128], index: 3, kind: output, shape index: {}]  }
   0x1   :  { %v14_v0 = vld [vmem:[%s1211_s2] sm:$0xff]  ;;  %v16_v2 = vld [vmem:[%s1212_s0 + $0x8] sm:$0xff]  ;;  %v107_v4 = vld [vmem:[%s1211_s2 + $0x10] sm:$0xff]  ;;  %vm103_vm2 = vcmask 261120  }
   0x2   :  { %v15_v1 = vld [vmem:[%s1212_s0] sm:$0xff]  ;;  %877 = vmatprep.subr.mxu0 %v14_v0  ;;  %v106_v3 = vld [vmem:[%s1211_s2 + $0x8] sm:$0xff]  ;;  %v111_v7 = vld [vmem:[%s1211_s2 + $0x30] sm:$0xff] }
   0x3   :  { %879 = vmatprep.mubr.msk.f32.mxu0 %vm19_vm0, %v15_v1  ;;  %878 = vmatpush3.msra.mxu0 %v14_v0  ;;  %v959_v5 = vpack.c.bf16 %v107_v4, %v106_v3  ;;  %v110_v6 = vld [vmem:[%s1211_s2 + $0x28] sm:$0xff]  ;;  %v108_v8 = vld [vmem:[%s1211_s2 + $0x18] sm:$0xff]  ;;  %v109_v11 = vld [vmem:[%s1211_s2 + $0x20] sm:$0xff] }
   0x4   :  { %880 = vmatmul.mubr.msk.f32.vlgmr.msra.gmra.mrb[0].mxu0 %vm19_vm0, %v16_v2  ;;  %967 = vmatprep.subr.bf16.mxu0 %v1036_v9  ;;  %v968_v10 = vpack.c.bf16 %v111_v7, %v110_v6  ;;  %v963_v12 = vpack.c.bf16 %v109_v11, %v108_v8  ;;  %v112_v13 = vld [vmem:[%s1211_s2 + $0x38] sm:$0xff]  ;;  %v113_v14 = vld [vmem:[%s1211_s2 + $0x40] sm:$0xff]  ;;  %v18_v17 = vld [vmem:[%s1213_s1 + $0x8] sm:$0xff] }
   0x5   :  { %960 = vmatprep.subr.bf16.mxu1 %v959_v5  ;;  %v971_v15 = vpack.c.bf16 %v113_v14, %v112_v13  ;;  %901 = vmatprep.mubr.msk.f32.mxu0 %vm1037_vm1, %v1038_v16  ;;  %v17_v18 = vld [vmem:[%s1213_s1] sm:$0xff]  ;;  %v817_v29 = vld [vmem:[%s1211_s2 + $0xa8] ss:$0 sm:$0xff]  ;;  %v414_v4 = vld [vmem:[%s1211_s2 + $0x50] sm:$0xff] }
   0x6   :  { %962 = vmatpush3.bf16.msra.mxu1 %v959_v5  ;;  %969 = vmatpush3.bf16.msra.mxu0 %v968_v10  ;;  %v413_v3 = vld [vmem:[%s1211_s2 + $0x48] sm:$0xff]  ;;  %v418_v7 = vld [vmem:[%s1211_s2 + $0x70] sm:$0xff]  ;;  %v415_v8 = vld [vmem:[%s1211_s2 + $0x58] sm:$0xff] }
   0x7   :  { %964 = vmatprep.subr.bf16.mxu1 %v963_v12  ;;  %970 = vmatprep.subr.bf16.mxu0 %v1036_v9  ;;  %v979_v5 = vpack.c.bf16 %v414_v4, %v413_v3  ;;  %v417_v6 = vld [vmem:[%s1211_s2 + $0x68] sm:$0xff]  ;;  %v416_v11 = vld [vmem:[%s1211_s2 + $0x60] sm:$0xff] }
   0x8   :  { %v420_v13 = vld [vmem:[%s1211_s2 + $0x80] sm:$0xff]  ;;  %v983_v14 = vpack.c.bf16 %v416_v11, %v415_v8 }
   0xa   :  { %966 = vmatpush3.bf16.msra.mxu1 %v963_v12  ;;  %972 = vmatpush3.bf16.msra.mxu0 %v971_v15  ;;  %v419_v12 = vld [vmem:[%s1211_s2 + $0x78] sm:$0xff] }
   0xb   :  { %973 = vmatprep.subr.bf16.mxu1 %v1036_v9  ;;  %980 = vmatprep.subr.bf16.mxu0 %v979_v5 }
   0xd   :  { %902 = vmatmul.mubr.f32.vlgmr.msra.gmra.mrb[2].mxu0 %v1038_v16 }
   0xe   :  { %982 = vmatpush3.bf16.msra.mxu0 %v979_v5 }
   0xf   :  { %984 = vmatprep.subr.bf16.mxu0 %v983_v14 }
  0x12   :  { %986 = vmatpush3.bf16.msra.mxu0 %v983_v14 }
  0x13   :  { %993 = vmatprep.subr.bf16.mxu0 %v1036_v9 }
  0xd7   :  { %v881_v19 = vpop.f32.mrb[0].mxu0 }
  0xd8   :  { %v98_v20 = vadd.f32 %v881_v19, %v18_v17  ;;  %v92_v21 = vpop.f32.mrb[1].mxu0 }
  0xd9   :  { %v93_v22 = vadd.f32 %v92_v21, %v17_v18 }
  0xda   :  { %v102_v23 = vmax.f32 %v98_v20, 0.0 }
  0xdb   :  { %v101_v24 = vmax.f32 %v93_v22, 0.0 }
  0xdc   :  { %105 = vst.msk [vmem:[#allocation2 + $0x8] sm:$0xff] %vm103_vm2, %v102_v23 }
  0xdd   :  { %104 = vst.msk [vmem:[#allocation2] sm:$0xff] %vm103_vm2, %v101_v24  ;;  %v825_v24 = vld [vmem:[%s1211_s2 + $0xb0] ss:$0 sm:$0xff] }
  0xe0   :  { %v271_v27 = vpop.f32.mrb[2].mxu0 }
  0xe1   :  { %v903_v28 = vpop.f32.mrb[3].mxu0 }
  0xe3   :  { %v1109_v26 = vld [vmem:[#allocation2 + $0x8] sm:$0xff] }
  0xe4   :  { %v115_v25 = vld [vmem:[#allocation2] sm:$0xff] }
  0xe5   :  { %890 = vmatprep.mubr.msk.f32.mxu1 %vm103_vm2, %v115_v25 }
  0xe6   :  { %891 = vmatmul.mubr.msk.f32.vlgmr.msra.gmra.mrb[0].mxu1 %vm103_vm2, %v1109_v26 }
  0xe7   :  { %975 = vmatpush3.bf16.msra.mxu1 %v968_v10  ;;  %912 = vmatprep.mubr.msk.f32.mxu1 %vm1037_vm1, %v1038_v16  ;;  %v988_v10 = vpack.c.bf16 %v418_v7, %v417_v6  ;;  %v833_v7 = vld [vmem:[%s1211_s2 + $0xb8] ss:$0 sm:$0xff] }
  0xe8   :  { %976 = vmatprep.subr.bf16.mxu1 %v1036_v9 }
  0xeb   :  { %978 = vmatpush3.bf16.msra.mxu1 %v971_v15  ;;  %v991_v15 = vpack.c.bf16 %v420_v13, %v419_v12 }
  0xec   :  { %987 = vmatprep.subr.bf16.mxu1 %v1036_v9 }
 0x1b9   :  { %v892_v30 = vpop.f32.mrb[0].mxu1 }
 0x1ba   :  { %v199_v31 = vadd.f32 %v892_v30, %v817_v29  ;;  %v193_v32 = vpop.f32.mrb[1].mxu1 }
 0x1bb   :  { %v194_v33 = vadd.f32 %v817_v29, %v193_v32 }
 0x1bd   :  { %v275_v34 = vadd.f32 %v271_v27, %v194_v33 }
 0x1bf   :  { %v820_v35 = vmul.f32 -1.442695, %v275_v34 }
 0x1c1   :  { %1012 = vpow2.f32 %v820_v35 }
 0x1cb   :  { %v1013_v36 = vpop.eup %1012 }
 0x1cc   :  { %v279_v37 = vadd.f32 1.0, %v1013_v36 }
 0x1ce   :  { %1014 = vrcp.f32 %v279_v37 }
 0x1d8   :  { %v1015_v38 = vpop.eup %1014 }
 0x1d9   :  { %v282_v39 = vmul.f32 2.0, %v1015_v38  ;;  %v284_v43 = vmul.f32 0.0, %v1015_v38 }
 0x1db   :  { %v821_v40 = vadd.f32 -1.0, %v282_v39 }
 0x1dd   :  { %286 = vrot.lane.b32.xlu0 %v821_v40, %s1039_s11 }
 0x24f   :  { %v287_v41 = vpop.permute.xlu0 %286 }
 0x250   :  { %v289_v42 = vmul.f32 %v1015_v38, %v287_v41 }
 0x252   :  { %291 = vrot.lane.b32.xlu0 %v289_v42, %s1039_s11 }
 0x2c4   :  { %v292_v44 = vpop.permute.xlu0 %291 }
 0x2c5   :  { %v294_v45 = vadd.f32 %v292_v44, %v284_v43 }
 0x2c7   :  { %1016 = vtanh.f32 %v294_v45 }
 0x2d1   :  { %v1017_v46 = vpop.eup %1016 }
 0x2d2   :  { %297 = vrot.lane.b32.xlu1 %v1017_v46, %s1039_s11 }
 0x344   :  { %v298_v47 = vpop.permute.xlu1 %297 }
 0x345   :  { %v300_v48 = vmul.f32 %v1015_v38, %v298_v47 }
 0x347   :  { %303 = vrot.lane.b32.xlu1 %v300_v48, %s1040_s12 }
 0x3b9   :  { %v304_v49 = vpop.permute.xlu1 %303 }
 0x3ba   :  { %v306_v50 = vadd.f32 %v304_v49, %v115_v25  ;;  %913 = vmatmul.mubr.msk.f32.vlgmr.msra.gmra.mrb[2].mxu1 %vm103_vm2, %v304_v49 }
 0x3bb   :  { %934 = vmatprep.mubr.msk.f32.mxu1 %vm1037_vm1, %v1038_v16  ;;  %989 = vmatpush3.bf16.msra.mxu1 %v988_v10 }
 0x3bc   :  { %307 = vst.msk [vmem:[#allocation2] sm:$0xff] %vm103_vm2, %v306_v50  ;;  %990 = vmatprep.subr.bf16.mxu1 %v1036_v9 }
 0x3bf   :  { %992 = vmatpush3.bf16.msra.mxu1 %v991_v15 }
 0x3c2   :  { %935 = vmatmul.mubr.f32.vlgmr.msra.gmra.mrb[4].mxu1 %v1038_v16 }
 0x3c3   :  { %v1128_v51 = vld [vmem:[#allocation2] sm:$0xff] }
 0x3c4   :  { %923 = vmatprep.mubr.msk.f32.mxu0 %vm103_vm2, %v1128_v51 }
 0x48d   :  { %v376_v52 = vpop.f32.mrb[2].mxu1 }
 0x48e   :  { %v380_v53 = vadd.f32 %v376_v52, %v199_v31  ;;  %v914_v54 = vpop.f32.mrb[3].mxu1 }
 0x490   :  { %v823_v55 = vmul.f32 -1.442695, %v380_v53 }
 0x492   :  { %1018 = vpow2.f32 %v823_v55 }
 0x495   :  { %v575_v22 = vpop.f32.mrb[4].mxu1 }
 0x496   :  { %v936_v23 = vpop.f32.mrb[5].mxu1 }
 0x49c   :  { %v1019_v56 = vpop.eup %1018 }
 0x49d   :  { %v384_v57 = vadd.f32 1.0, %v1019_v56 }
 0x49f   :  { %1020 = vrcp.f32 %v384_v57 }
 0x4a9   :  { %v1021_v58 = vpop.eup %1020 }
 0x4aa   :  { %v387_v59 = vmul.f32 2.0, %v1021_v58  ;;  %v389_v63 = vmul.f32 %v1021_v58, %v294_v45 }
 0x4ac   :  { %v824_v60 = vadd.f32 -1.0, %v387_v59 }
 0x4ae   :  { %391 = vrot.lane.b32.xlu0 %v824_v60, %s1039_s11  ;;  %v717_v60 = vld [vmem:[%s1211_s2 + $0x88] sm:$0xff] }
 0x520   :  { %v392_v61 = vpop.permute.xlu0 %391 }
 0x521   :  { %v394_v62 = vmul.f32 %v1021_v58, %v392_v61  ;;  %v718_v61 = vld [vmem:[%s1211_s2 + $0x90] sm:$0xff] }
 0x523   :  { %396 = vrot.lane.b32.xlu1 %v394_v62, %s1039_s11  ;;  %v999_v62 = vpack.c.bf16 %v718_v61, %v717_v60 }
 0x525   :  { %1000 = vmatprep.subr.bf16.mxu1 %v999_v62 }
 0x526   :  { %1002 = vmatpush3.bf16.msra.mxu1 %v999_v62 }
 0x595   :  { %v397_v0 = vpop.permute.xlu1 %396 }
 0x596   :  { %v399_v1 = vadd.f32 %v397_v0, %v389_v63  ;;  %v719_v63 = vld [vmem:[%s1211_s2 + $0x98] sm:$0xff]  ;;  %v720_v0 = vld [vmem:[%s1211_s2 + $0xa0] sm:$0xff] }
 0x598   :  { %1022 = vtanh.f32 %v399_v1  ;;  %v1003_v1 = vpack.c.bf16 %v720_v0, %v719_v63 }
 0x59a   :  { %1004 = vmatprep.subr.bf16.mxu1 %v1003_v1 }
 0x59b   :  { %1006 = vmatpush3.bf16.msra.mxu1 %v1003_v1 }
 0x5a2   :  { %v1023_v2 = vpop.eup %1022 }
 0x5a3   :  { %402 = vrot.lane.b32.xlu0 %v1023_v2, %s1039_s11 }
 0x615   :  { %v403_v17 = vpop.permute.xlu0 %402 }
 0x616   :  { %v405_v18 = vmul.f32 %v1021_v58, %v403_v17 }
 0x618   :  { %408 = vrot.lane.b32.xlu1 %v405_v18, %s1040_s12 }
 0x68a   :  { %v409_v19 = vpop.permute.xlu1 %408 }
 0x68b   :  { %v411_v20 = vadd.f32 %v409_v19, %v1109_v26 }
 0x68d   :  { %412 = vst.msk [vmem:[#allocation2 + $0x8] sm:$0xff] %vm103_vm2, %v411_v20 }
 0x694   :  { %v1165_v21 = vld [vmem:[#allocation2 + $0x8] sm:$0xff] }
 0x695   :  { %924 = vmatmul.mubr.msk.f32.vlgmr.msra.gmra.mrb[4].mxu0 %vm103_vm2, %v1165_v21 }
 0x696   :  { %995 = vmatpush3.bf16.msra.mxu0 %v988_v10  ;;  %945 = vmatprep.mubr.msk.f32.mxu0 %vm1037_vm1, %v1038_v16 }
 0x697   :  { %996 = vmatprep.subr.bf16.mxu0 %v1036_v9 }
 0x69a   :  { %998 = vmatpush3.bf16.msra.mxu0 %v991_v15 }
 0x768   :  { %v925_v25 = vpop.f32.mrb[4].mxu0 }
 0x769   :  { %v506_v26 = vadd.f32 %v925_v25, %v825_v24  ;;  %v500_v27 = vpop.f32.mrb[5].mxu0 }
 0x76a   :  { %v501_v28 = vadd.f32 %v825_v24, %v500_v27 }
 0x76c   :  { %v579_v29 = vadd.f32 %v575_v22, %v501_v28 }
 0x76e   :  { %v828_v30 = vmul.f32 -1.442695, %v579_v29 }
 0x770   :  { %1024 = vpow2.f32 %v828_v30 }
 0x77a   :  { %v1025_v31 = vpop.eup %1024 }
 0x77b   :  { %v583_v32 = vadd.f32 1.0, %v1025_v31 }
 0x77d   :  { %1026 = vrcp.f32 %v583_v32 }
 0x787   :  { %v1027_v16 = vpop.eup %1026 }
 0x788   :  { %v586_v33 = vmul.f32 2.0, %v1027_v16  ;;  %v588_v36 = vmul.f32 0.0, %v1027_v16 }
 0x78a   :  { %v829_v9 = vadd.f32 -1.0, %v586_v33 }
 0x78c   :  { %590 = vrot.lane.b32.xlu0 %v829_v9, %s1039_s11 }
 0x7fe   :  { %v591_v34 = vpop.permute.xlu0 %590 }
 0x7ff   :  { %v593_v35 = vmul.f32 %v1027_v16, %v591_v34 }
 0x801   :  { %595 = vrot.lane.b32.xlu1 %v593_v35, %s1039_s11 }
 0x873   :  { %v596_v37 = vpop.permute.xlu1 %595 }
 0x874   :  { %v598_v38 = vadd.f32 %v596_v37, %v588_v36 }
 0x876   :  { %1028 = vtanh.f32 %v598_v38 }
 0x880   :  { %v1029_v39 = vpop.eup %1028 }
 0x881   :  { %601 = vrot.lane.b32.xlu0 %v1029_v39, %s1039_s11 }
 0x8f3   :  { %v602_v40 = vpop.permute.xlu0 %601 }
 0x8f4   :  { %v604_v41 = vmul.f32 %v1027_v16, %v602_v40 }
 0x8f6   :  { %607 = vrot.lane.b32.xlu1 %v604_v41, %s1040_s12 }
 0x968   :  { %v608_v42 = vpop.permute.xlu1 %607 }
 0x969   :  { %v610_v43 = vadd.f32 %v608_v42, %v1128_v51  ;;  %946 = vmatmul.mubr.msk.f32.vlgmr.msra.gmra.mrb[6].mxu0 %vm103_vm2, %v608_v42 }
 0x96b   :  { %611 = vst.msk [vmem:[#allocation2] sm:$0xff] %vm103_vm2, %v610_v43 }
 0x972   :  { %v722_v44 = vld [vmem:[#allocation2] sm:$0xff] }
 0x973   :  { %956 = vmatprep.mubr.msk.f32.mxu1 %vm103_vm2, %v722_v44 }
 0xa3c   :  { %v680_v45 = vpop.f32.mrb[6].mxu0 }
 0xa3d   :  { %v684_v46 = vadd.f32 %v680_v45, %v506_v26  ;;  %v947_v47 = vpop.f32.mrb[7].mxu0 }
 0xa3f   :  { %v831_v48 = vmul.f32 -1.442695, %v684_v46 }
 0xa41   :  { %1030 = vpow2.f32 %v831_v48 }
 0xa4b   :  { %v1031_v49 = vpop.eup %1030 }
 0xa4c   :  { %v688_v50 = vadd.f32 1.0, %v1031_v49 }
 0xa4e   :  { %1032 = vrcp.f32 %v688_v50 }
 0xa58   :  { %v1033_v52 = vpop.eup %1032 }
 0xa59   :  { %v691_v53 = vmul.f32 2.0, %v1033_v52  ;;  %v693_v56 = vmul.f32 %v1033_v52, %v598_v38 }
 0xa5b   :  { %v832_v54 = vadd.f32 -1.0, %v691_v53 }
 0xa5d   :  { %695 = vrot.lane.b32.xlu0 %v832_v54, %s1039_s11 }
 0xacf   :  { %v696_v51 = vpop.permute.xlu0 %695 }
 0xad0   :  { %v698_v55 = vmul.f32 %v1033_v52, %v696_v51 }
 0xad2   :  { %700 = vrot.lane.b32.xlu1 %v698_v55, %s1039_s11 }
 0xb44   :  { %v701_v57 = vpop.permute.xlu1 %700 }
 0xb45   :  { %v703_v58 = vadd.f32 %v701_v57, %v693_v56 }
 0xb47   :  { %1034 = vtanh.f32 %v703_v58 }
 0xb51   :  { %v1035_v59 = vpop.eup %1034 }
 0xb52   :  { %706 = vrot.lane.b32.xlu0 %v1035_v59, %s1039_s11 }
 0xbc4   :  { %v707_v2 = vpop.permute.xlu0 %706 }
 0xbc5   :  { %v709_v3 = vmul.f32 %v1033_v52, %v707_v2 }
 0xbc7   :  { %712 = vrot.lane.b32.xlu1 %v709_v3, %s1040_s12 }
 0xc39   :  { %v713_v4 = vpop.permute.xlu1 %712 }
 0xc3a   :  { %v715_v5 = vadd.f32 %v713_v4, %v1165_v21 }
 0xc3c   :  { %716 = vst.msk [vmem:[#allocation2 + $0x8] sm:$0xff] %vm103_vm2, %v715_v5 }
 0xc43   :  { %v723_v6 = vld [vmem:[#allocation2 + $0x8] sm:$0xff] }
 0xc44   :  { %957 = vmatmul.mubr.msk.f32.vlgmr.msra.gmra.mrb[6].mxu1 %vm103_vm2, %v723_v6 }
 0xd17   :  { %v958_v8 = vpop.f32.mrb[6].mxu1 }
 0xd18   :  { %v806_v10 = vadd.f32 %v958_v8, %v833_v7  ;;  %v800_v11 = vpop.f32.mrb[7].mxu1 }
 0xd19   :  { %v801_v12 = vadd.f32 %v833_v7, %v800_v11 }
 0xd1a   :  { %810 = vst [vmem:[%s1214_s3 + $0x8] sm:$0xff] %v806_v10 }
 0xd1b   :  { %809 = vst [vmem:[%s1214_s3] sm:$0xff] %v801_v12 }

</bundles_post_ra>
